<compile_context>
chip_gen: v7x
topology: tpu7x:2x2x1
jax: 0.10.0
libtpu: 0.0.40
codegen_flags: <defaults>
</compile_context>

<pallas_src>
import functools

import jax
import jax.numpy as jnp
from jax.experimental import pallas as pl
from jax.experimental.pallas import tpu as pltpu


def _fused_mhsa_kernel(x_ref, wqkv_ref, bqkv_ref, gl_ref, rep_ref, go_ref,
                       wf_ref, bf_ref, o_ref, y_scr,
                       *, num_heads, head_dim, seq_len, batch_block):
    H, D, S, BB = num_heads, head_dim, seq_len, batch_block
    E = H * D
    R = BB * S                     # rows (b, s) handled by this grid step

    x = x_ref[...].astype(jnp.bfloat16)                                 # (R, E)

    # ---- fused Q|K|V projection: one (R, E) @ (E, 3E) bf16 MXU pass ----
    qkv = (jnp.dot(x, wqkv_ref[...], preferred_element_type=jnp.float32)
           + bqkv_ref[...])                                             # (R, 3E)
    q = qkv[:, 0:E]            # 1/sqrt(D) already folded into the Q weights
    k = qkv[:, E:2 * E]
    v = qkv[:, 2 * E:3 * E]

    # ---- head-vs-head logits for ALL query heads in ONE MXU call ----
    # qrep[r, i*E + j*D + d] = q[r, i*D + d]; krep[r, i*E + j*D + d] = k[r, j*D + d]
    qrep = jnp.concatenate(
        [q[:, i * D:(i + 1) * D] for i in range(H) for _ in range(H)], axis=1)
    krep = jnp.concatenate([k] * H, axis=1)                             # (R, H*E)
    prod = (qrep * krep).astype(jnp.bfloat16)
    # gl = kron(I_H, G): logits[r, i*H + j] = sum_d q[r, i*D+d] * k[r, j*D+d]
    logits = jnp.dot(prod, gl_ref[...], preferred_element_type=jnp.float32)  # (R, H*H)

    # ---- grouped softmax over key heads j within each query head i ----
    p_blocks = []
    for i in range(H):
        li = logits[:, i * H:(i + 1) * H]                               # (R, H)
        mi = jnp.max(li, axis=-1, keepdims=True)
        ei = jnp.exp(li - mi)
        si = jnp.sum(ei, axis=-1, keepdims=True)
        p_blocks.append(ei * pl.reciprocal(si, approx=True))
    p = jnp.concatenate(p_blocks, axis=1).astype(jnp.bfloat16)          # (R, H*H)

    # ---- attention-weighted values for ALL heads in two MXU calls ----
    # prep[r, i*E + j*D + d] = p[r, i*H + j]   (rep = kron(I_H, G^T))
    prep = jnp.dot(p, rep_ref[...], preferred_element_type=jnp.float32)  # (R, H*E)
    vrep = jnp.concatenate([v] * H, axis=1)                              # (R, H*E)
    pv = (prep * vrep).astype(jnp.bfloat16)
    # go = kron(I_H, GD): out_all[r, i*D+d] = sum_j p[r, i*H+j] * v[r, j*D+d]
    out_all = jnp.dot(pv, go_ref[...], preferred_element_type=jnp.float32)  # (R, E)

    # ---- torch `.resize(B, S, E)` == row-major reinterpretation of (b,h,s,d)
    # build the (b, head, s)-ordered stack as a value, ONE scratch store,
    # then H sublane-strided reads give the resized rows.
    stack = jnp.concatenate(
        [out_all[b * S:(b + 1) * S, i * D:(i + 1) * D]
         for b in range(BB) for i in range(H)], axis=0)                 # (R*H, D)
    y_scr[...] = stack
    y = jnp.concatenate(
        [y_scr[pl.ds(j, R, stride=H), :] for j in range(H)],
        axis=1).astype(jnp.bfloat16)                                    # (R, E)

    # ---- fused fc_linear, lane-dense (R, E) store ----
    o_ref[...] = (jnp.dot(y, wf_ref[...], preferred_element_type=jnp.float32)
                  + bf_ref[...])


def prepare_params(params, num_heads):
    """One-time glue (keep OUTSIDE the per-call path): transpose the PyTorch
    (out, in) weights to (in, out), fuse Q|K|V into one (E, 3E) matmul, fold
    the 1/sqrt(D) attention scale into the Q projection, cast weights to bf16
    and build the block-diagonal 0/1 matrices used to batch the per-head
    reductions into single wide MXU calls."""
    E = params["wq"].shape[0]
    H = num_heads
    D = E // H
    inv_scale = 1.0 / (D ** 0.5)              # torch: attention / self.dim**0.5

    wq = params["wq"].T * inv_scale
    bq = params["bq"] * inv_scale
    wqkv = jnp.concatenate([wq, params["wk"].T, params["wv"].T],
                           axis=1).astype(jnp.bfloat16)                  # (E, 3E)
    bqkv = jnp.concatenate([bq, params["bk"], params["bv"]]
                           ).reshape(1, 3 * E).astype(jnp.float32)       # (1, 3E)
    wf = params["wf"].T.astype(jnp.bfloat16)                             # (E, E)
    bf = params["bf"].reshape(1, E).astype(jnp.float32)                  # (1, E)

    eye_h = jnp.eye(H, dtype=jnp.float32)
    g = jnp.repeat(eye_h, D, axis=0)                    # (E, H): g[j*D+d, j] = 1
    gd = jnp.tile(jnp.eye(D, dtype=jnp.float32), (H, 1))  # (E, D): gd[j*D+d, d] = 1
    gl = jnp.kron(eye_h, g).astype(jnp.bfloat16)        # (H*E, H*H) logits reducer
    rep = jnp.kron(eye_h, g.T).astype(jnp.bfloat16)     # (H*H, H*E) p broadcaster
    go = jnp.kron(eye_h, gd).astype(jnp.bfloat16)       # (H*E, E)   out reducer
    return dict(wqkv=wqkv, bqkv=bqkv, wf=wf, bf=bf, gl=gl, rep=rep, go=go)


def _pick_batch_block(B, S, target_rows=512, min_grid=2):
    """Largest number of whole batches per grid step with a sublane-friendly
    row count and <= target_rows rows, preferring >= min_grid grid steps so
    the 'parallel' grid axis can be sharded across TensorCores (v7x)."""
    cands = [bb for bb in range(B, 0, -1)
             if B % bb == 0 and ((bb * S) % 8 == 0 or bb == B)]
    fitting = [bb for bb in cands if bb * S <= target_rows] or cands[-1:]
    for bb in fitting:
        if B // bb >= min_grid:
            return bb
    return fitting[0]


def prob_sparse_mhsa(x, prepared, num_heads):
    B, S, E = x.shape
    H = num_heads
    assert E % H == 0
    D = E // H
    BB = _pick_batch_block(B, S)
    R = BB * S

    x2 = x.reshape(B * S, E)               # free reshape; rows = (b, s)

    def full(shape):
        return pl.BlockSpec(shape, lambda i: (0, 0))

    out2 = pl.pallas_call(
        functools.partial(_fused_mhsa_kernel, num_heads=H, head_dim=D,
                          seq_len=S, batch_block=BB),
        out_shape=jax.ShapeDtypeStruct((B * S, E), jnp.float32),
        grid=(B // BB,),
        in_specs=[
            pl.BlockSpec((R, E), lambda i: (i, 0)),      # x rows
            full((E, 3 * E)),                            # fused Wqkv (bf16)
            full((1, 3 * E)),                            # fused bias (f32)
            full((H * E, H * H)),                        # gl
            full((H * H, H * E)),                        # rep
            full((H * E, E)),                            # go
            full((E, E)),                                # Wf (bf16)
            full((1, E)),                                # bf (f32)
        ],
        out_specs=pl.BlockSpec((R, E), lambda i: (i, 0)),
        scratch_shapes=[pltpu.VMEM((R * H, D), jnp.float32)],
        compiler_params=pltpu.CompilerParams(dimension_semantics=("parallel",)),
    )(x2, prepared["wqkv"], prepared["bqkv"], prepared["gl"], prepared["rep"],
      prepared["go"], prepared["wf"], prepared["bf"])

    return out2.reshape(B, S, E)


def init_params(key, embed_size):
    """Deterministic synthetic init (uniform, like nn.Linear's bound)."""
    ks = jax.random.split(key, 8)
    bound = 1.0 / (embed_size ** 0.5)
    u = lambda k, shape: jax.random.uniform(k, shape, jnp.float32, -bound, bound)
    return dict(
        wq=u(ks[0], (embed_size, embed_size)), bq=u(ks[1], (embed_size,)),
        wk=u(ks[2], (embed_size, embed_size)), bk=u(ks[3], (embed_size,)),
        wv=u(ks[4], (embed_size, embed_size)), bv=u(ks[5], (embed_size,)),
        wf=u(ks[6], (embed_size, embed_size)), bf=u(ks[7], (embed_size,)),
    )


def ref_forward(x, params, num_heads):
    """Pure-JAX f32 transcription of the PyTorch forward (for validation)."""
    B, S, E = x.shape
    D = E // num_heads
    q = x @ params["wq"].T + params["bq"]
    k = x @ params["wk"].T + params["bk"]
    v = x @ params["wv"].T + params["bv"]
    q = q.reshape(B, S, num_heads, D).transpose(0, 2, 1, 3)   # (B, H, S, D)
    k = k.reshape(B, S, num_heads, D).transpose(0, 2, 1, 3)
    v = v.reshape(B, S, num_heads, D).transpose(0, 2, 1, 3)
    att = jnp.einsum("nqhd,nkhd->nhqk", q, k)                 # (B, S, H, H)
    att = jax.nn.softmax(att / (D ** 0.5), axis=-1)
    out = jnp.einsum("nhql,nlhd->nqhd", att, v)               # (B, H, S, D)
    out = out.reshape(B, S, E)                                # torch .resize
    return out @ params["wf"].T + params["bf"]


if __name__ == "__main__":
    B, S, E, H = 2, 8, 32, 4
    key = jax.random.PRNGKey(0)
    kx, kp = jax.random.split(key)
    x = jax.random.normal(kx, (B, S, E), jnp.float32)
    params = init_params(kp, E)

    prepared = prepare_params(params, H)      # one-time weight prep / fusion
    out = prob_sparse_mhsa(x, prepared, H)
    out = jax.block_until_ready(out)

    ref = ref_forward(x, params, H)
    assert out.shape == (B, S, E)
    # bf16 matmuls + approx-reciprocal softmax normalization -> loose tolerance
    assert jnp.allclose(out, ref, atol=5e-2, rtol=5e-2), "mismatch vs reference"
    print("KERNEL_OK")
</pallas_src>

<mosaic_0001>
module attributes {stable_mosaic.version = 11 : i64} {
  func.func @_fused_mhsa_kernel(%arg0: i32, %arg1: memref<8x32xf32, #tpu.memory_space<vmem>>, %arg2: memref<32x96xbf16, #tpu.memory_space<vmem>>, %arg3: memref<1x96xf32, #tpu.memory_space<vmem>>, %arg4: memref<128x16xbf16, #tpu.memory_space<vmem>>, %arg5: memref<16x128xbf16, #tpu.memory_space<vmem>>, %arg6: memref<128x32xbf16, #tpu.memory_space<vmem>>, %arg7: memref<32x32xbf16, #tpu.memory_space<vmem>>, %arg8: memref<1x32xf32, #tpu.memory_space<vmem>>, %arg9: memref<8x32xf32, #tpu.memory_space<vmem>>, %arg10: memref<32x8xf32, #tpu.memory_space<vmem>>) attributes {dimension_semantics = [#tpu.dimension_semantics<parallel>], iteration_bounds = array<i64: 2>, scalar_prefetch = 0 : i64, scratch_operands = 1 : i64, tpu.core_type = #tpu.core_type<tc>, window_params = [{transform_indices = @transform_0, window_bounds = array<i64: 8, 32>}, {pipeline_mode = #tpu.pipeline_mode<synchronous>, transform_indices = @transform_1, window_bounds = array<i64: 32, 96>}, {pipeline_mode = #tpu.pipeline_mode<synchronous>, transform_indices = @transform_2, window_bounds = array<i64: 1, 96>}, {pipeline_mode = #tpu.pipeline_mode<synchronous>, transform_indices = @transform_3, window_bounds = array<i64: 128, 16>}, {pipeline_mode = #tpu.pipeline_mode<synchronous>, transform_indices = @transform_4, window_bounds = array<i64: 16, 128>}, {pipeline_mode = #tpu.pipeline_mode<synchronous>, transform_indices = @transform_5, window_bounds = array<i64: 128, 32>}, {pipeline_mode = #tpu.pipeline_mode<synchronous>, transform_indices = @transform_6, window_bounds = array<i64: 32, 32>}, {pipeline_mode = #tpu.pipeline_mode<synchronous>, transform_indices = @transform_7, window_bounds = array<i64: 1, 32>}, {transform_indices = @transform_8, window_bounds = array<i64: 8, 32>}]} {
    %c0 = arith.constant 0 : index
    %c0_0 = arith.constant 0 : index
    %0 = vector.load %arg1[%c0, %c0_0] : memref<8x32xf32, #tpu.memory_space<vmem>>, vector<8x32xf32>
    %1 = arith.truncf %0 : vector<8x32xf32> to vector<8x32xbf16>
    %c0_1 = arith.constant 0 : index
    %c0_2 = arith.constant 0 : index
    %2 = vector.load %arg2[%c0_1, %c0_2] : memref<32x96xbf16, #tpu.memory_space<vmem>>, vector<32x96xbf16>
    %cst = arith.constant dense<0.000000e+00> : vector<8x96xf32>
    %3 = tpu.matmul %1, %2, %cst {dimension_numbers = #tpu.dot_dimension_numbers<[1], [0], [0], [1], [0, 0, 1, 1], [], []>} : vector<8x32xbf16>, vector<32x96xbf16>, vector<8x96xf32> -> vector<8x96xf32>
    %c0_3 = arith.constant 0 : index
    %c0_4 = arith.constant 0 : index
    %4 = vector.load %arg3[%c0_3, %c0_4] : memref<1x96xf32, #tpu.memory_space<vmem>>, vector<1x96xf32>
    %5 = vector.broadcast %4 : vector<1x96xf32> to vector<8x96xf32>
    %6 = arith.addf %3, %5 : vector<8x96xf32>
    %7 = vector.extract_strided_slice %6 {offsets = [0, 0], sizes = [8, 32], strides = [1, 1]} : vector<8x96xf32> to vector<8x32xf32>
    %8 = vector.extract_strided_slice %6 {offsets = [0, 32], sizes = [8, 32], strides = [1, 1]} : vector<8x96xf32> to vector<8x32xf32>
    %9 = vector.extract_strided_slice %6 {offsets = [0, 64], sizes = [8, 32], strides = [1, 1]} : vector<8x96xf32> to vector<8x32xf32>
    %10 = vector.extract_strided_slice %7 {offsets = [0, 0], sizes = [8, 8], strides = [1, 1]} : vector<8x32xf32> to vector<8x8xf32>
    %11 = vector.extract_strided_slice %7 {offsets = [0, 0], sizes = [8, 8], strides = [1, 1]} : vector<8x32xf32> to vector<8x8xf32>
    %12 = vector.extract_strided_slice %7 {offsets = [0, 0], sizes = [8, 8], strides = [1, 1]} : vector<8x32xf32> to vector<8x8xf32>
    %13 = vector.extract_strided_slice %7 {offsets = [0, 0], sizes = [8, 8], strides = [1, 1]} : vector<8x32xf32> to vector<8x8xf32>
    %14 = vector.extract_strided_slice %7 {offsets = [0, 8], sizes = [8, 8], strides = [1, 1]} : vector<8x32xf32> to vector<8x8xf32>
    %15 = vector.extract_strided_slice %7 {offsets = [0, 8], sizes = [8, 8], strides = [1, 1]} : vector<8x32xf32> to vector<8x8xf32>
    %16 = vector.extract_strided_slice %7 {offsets = [0, 8], sizes = [8, 8], strides = [1, 1]} : vector<8x32xf32> to vector<8x8xf32>
    %17 = vector.extract_strided_slice %7 {offsets = [0, 8], sizes = [8, 8], strides = [1, 1]} : vector<8x32xf32> to vector<8x8xf32>
    %18 = vector.extract_strided_slice %7 {offsets = [0, 16], sizes = [8, 8], strides = [1, 1]} : vector<8x32xf32> to vector<8x8xf32>
    %19 = vector.extract_strided_slice %7 {offsets = [0, 16], sizes = [8, 8], strides = [1, 1]} : vector<8x32xf32> to vector<8x8xf32>
    %20 = vector.extract_strided_slice %7 {offsets = [0, 16], sizes = [8, 8], strides = [1, 1]} : vector<8x32xf32> to vector<8x8xf32>
    %21 = vector.extract_strided_slice %7 {offsets = [0, 16], sizes = [8, 8], strides = [1, 1]} : vector<8x32xf32> to vector<8x8xf32>
    %22 = vector.extract_strided_slice %7 {offsets = [0, 24], sizes = [8, 8], strides = [1, 1]} : vector<8x32xf32> to vector<8x8xf32>
    %23 = vector.extract_strided_slice %7 {offsets = [0, 24], sizes = [8, 8], strides = [1, 1]} : vector<8x32xf32> to vector<8x8xf32>
    %24 = vector.extract_strided_slice %7 {offsets = [0, 24], sizes = [8, 8], strides = [1, 1]} : vector<8x32xf32> to vector<8x8xf32>
    %25 = vector.extract_strided_slice %7 {offsets = [0, 24], sizes = [8, 8], strides = [1, 1]} : vector<8x32xf32> to vector<8x8xf32>
    %26 = tpu.concatenate %10, %11, %12, %13, %14, %15, %16, %17, %18, %19, %20, %21, %22, %23, %24, %25 in 1 : vector<8x8xf32>, vector<8x8xf32>, vector<8x8xf32>, vector<8x8xf32>, vector<8x8xf32>, vector<8x8xf32>, vector<8x8xf32>, vector<8x8xf32>, vector<8x8xf32>, vector<8x8xf32>, vector<8x8xf32>, vector<8x8xf32>, vector<8x8xf32>, vector<8x8xf32>, vector<8x8xf32>, vector<8x8xf32> -> vector<8x128xf32>
    %27 = tpu.concatenate %8, %8, %8, %8 in 1 : vector<8x32xf32>, vector<8x32xf32>, vector<8x32xf32>, vector<8x32xf32> -> vector<8x128xf32>
    %28 = arith.mulf %26, %27 : vector<8x128xf32>
    %29 = arith.truncf %28 : vector<8x128xf32> to vector<8x128xbf16>
    %c0_5 = arith.constant 0 : index
    %c0_6 = arith.constant 0 : index
    %30 = vector.load %arg4[%c0_5, %c0_6] : memref<128x16xbf16, #tpu.memory_space<vmem>>, vector<128x16xbf16>
    %cst_7 = arith.constant dense<0.000000e+00> : vector<8x16xf32>
    %31 = tpu.matmul %29, %30, %cst_7 {dimension_numbers = #tpu.dot_dimension_numbers<[1], [0], [0], [1], [0, 0, 1, 1], [], []>} : vector<8x128xbf16>, vector<128x16xbf16>, vector<8x16xf32> -> vector<8x16xf32>
    %32 = vector.extract_strided_slice %31 {offsets = [0, 0], sizes = [8, 4], strides = [1, 1]} : vector<8x16xf32> to vector<8x4xf32>
    %cst_8 = arith.constant dense<0xFF800000> : vector<8xf32>
    %33 = vector.multi_reduction <maximumf>, %32, %cst_8 [1] : vector<8x4xf32> to vector<8xf32>
    %34 = vector.shape_cast %33 : vector<8xf32> to vector<8x1xf32>
    %35 = vector.broadcast %34 : vector<8x1xf32> to vector<8x4xf32>
    %36 = arith.subf %32, %35 : vector<8x4xf32>
    %37 = math.exp %36 : vector<8x4xf32>
    %cst_9 = arith.constant dense<0.000000e+00> : vector<8xf32>
    %38 = vector.multi_reduction <add>, %37, %cst_9 [1] : vector<8x4xf32> to vector<8xf32>
    %39 = vector.shape_cast %38 : vector<8xf32> to vector<8x1xf32>
    %40 = tpu.reciprocal %39 {approx = true} : vector<8x1xf32> -> vector<8x1xf32>
    %41 = vector.broadcast %40 : vector<8x1xf32> to vector<8x4xf32>
    %42 = arith.mulf %37, %41 : vector<8x4xf32>
    %43 = vector.extract_strided_slice %31 {offsets = [0, 4], sizes = [8, 4], strides = [1, 1]} : vector<8x16xf32> to vector<8x4xf32>
    %cst_10 = arith.constant dense<0xFF800000> : vector<8xf32>
    %44 = vector.multi_reduction <maximumf>, %43, %cst_10 [1] : vector<8x4xf32> to vector<8xf32>
    %45 = vector.shape_cast %44 : vector<8xf32> to vector<8x1xf32>
    %46 = vector.broadcast %45 : vector<8x1xf32> to vector<8x4xf32>
    %47 = arith.subf %43, %46 : vector<8x4xf32>
    %48 = math.exp %47 : vector<8x4xf32>
    %cst_11 = arith.constant dense<0.000000e+00> : vector<8xf32>
    %49 = vector.multi_reduction <add>, %48, %cst_11 [1] : vector<8x4xf32> to vector<8xf32>
    %50 = vector.shape_cast %49 : vector<8xf32> to vector<8x1xf32>
    %51 = tpu.reciprocal %50 {approx = true} : vector<8x1xf32> -> vector<8x1xf32>
    %52 = vector.broadcast %51 : vector<8x1xf32> to vector<8x4xf32>
    %53 = arith.mulf %48, %52 : vector<8x4xf32>
    %54 = vector.extract_strided_slice %31 {offsets = [0, 8], sizes = [8, 4], strides = [1, 1]} : vector<8x16xf32> to vector<8x4xf32>
    %cst_12 = arith.constant dense<0xFF800000> : vector<8xf32>
    %55 = vector.multi_reduction <maximumf>, %54, %cst_12 [1] : vector<8x4xf32> to vector<8xf32>
    %56 = vector.shape_cast %55 : vector<8xf32> to vector<8x1xf32>
    %57 = vector.broadcast %56 : vector<8x1xf32> to vector<8x4xf32>
    %58 = arith.subf %54, %57 : vector<8x4xf32>
    %59 = math.exp %58 : vector<8x4xf32>
    %cst_13 = arith.constant dense<0.000000e+00> : vector<8xf32>
    %60 = vector.multi_reduction <add>, %59, %cst_13 [1] : vector<8x4xf32> to vector<8xf32>
    %61 = vector.shape_cast %60 : vector<8xf32> to vector<8x1xf32>
    %62 = tpu.reciprocal %61 {approx = true} : vector<8x1xf32> -> vector<8x1xf32>
    %63 = vector.broadcast %62 : vector<8x1xf32> to vector<8x4xf32>
    %64 = arith.mulf %59, %63 : vector<8x4xf32>
    %65 = vector.extract_strided_slice %31 {offsets = [0, 12], sizes = [8, 4], strides = [1, 1]} : vector<8x16xf32> to vector<8x4xf32>
    %cst_14 = arith.constant dense<0xFF800000> : vector<8xf32>
    %66 = vector.multi_reduction <maximumf>, %65, %cst_14 [1] : vector<8x4xf32> to vector<8xf32>
    %67 = vector.shape_cast %66 : vector<8xf32> to vector<8x1xf32>
    %68 = vector.broadcast %67 : vector<8x1xf32> to vector<8x4xf32>
    %69 = arith.subf %65, %68 : vector<8x4xf32>
    %70 = math.exp %69 : vector<8x4xf32>
    %cst_15 = arith.constant dense<0.000000e+00> : vector<8xf32>
    %71 = vector.multi_reduction <add>, %70, %cst_15 [1] : vector<8x4xf32> to vector<8xf32>
    %72 = vector.shape_cast %71 : vector<8xf32> to vector<8x1xf32>
    %73 = tpu.reciprocal %72 {approx = true} : vector<8x1xf32> -> vector<8x1xf32>
    %74 = vector.broadcast %73 : vector<8x1xf32> to vector<8x4xf32>
    %75 = arith.mulf %70, %74 : vector<8x4xf32>
    %76 = tpu.concatenate %42, %53, %64, %75 in 1 : vector<8x4xf32>, vector<8x4xf32>, vector<8x4xf32>, vector<8x4xf32> -> vector<8x16xf32>
    %77 = arith.truncf %76 : vector<8x16xf32> to vector<8x16xbf16>
    %c0_16 = arith.constant 0 : index
    %c0_17 = arith.constant 0 : index
    %78 = vector.load %arg5[%c0_16, %c0_17] : memref<16x128xbf16, #tpu.memory_space<vmem>>, vector<16x128xbf16>
    %cst_18 = arith.constant dense<0.000000e+00> : vector<8x128xf32>
    %79 = tpu.matmul %77, %78, %cst_18 {dimension_numbers = #tpu.dot_dimension_numbers<[1], [0], [0], [1], [0, 0, 1, 1], [], []>} : vector<8x16xbf16>, vector<16x128xbf16>, vector<8x128xf32> -> vector<8x128xf32>
    %80 = tpu.concatenate %9, %9, %9, %9 in 1 : vector<8x32xf32>, vector<8x32xf32>, vector<8x32xf32>, vector<8x32xf32> -> vector<8x128xf32>
    %81 = arith.mulf %79, %80 : vector<8x128xf32>
    %82 = arith.truncf %81 : vector<8x128xf32> to vector<8x128xbf16>
    %c0_19 = arith.constant 0 : index
    %c0_20 = arith.constant 0 : index
    %83 = vector.load %arg6[%c0_19, %c0_20] : memref<128x32xbf16, #tpu.memory_space<vmem>>, vector<128x32xbf16>
    %cst_21 = arith.constant dense<0.000000e+00> : vector<8x32xf32>
    %84 = tpu.matmul %82, %83, %cst_21 {dimension_numbers = #tpu.dot_dimension_numbers<[1], [0], [0], [1], [0, 0, 1, 1], [], []>} : vector<8x128xbf16>, vector<128x32xbf16>, vector<8x32xf32> -> vector<8x32xf32>
    %85 = vector.extract_strided_slice %84 {offsets = [0, 0], sizes = [8, 8], strides = [1, 1]} : vector<8x32xf32> to vector<8x8xf32>
    %86 = vector.extract_strided_slice %84 {offsets = [0, 8], sizes = [8, 8], strides = [1, 1]} : vector<8x32xf32> to vector<8x8xf32>
    %87 = vector.extract_strided_slice %84 {offsets = [0, 16], sizes = [8, 8], strides = [1, 1]} : vector<8x32xf32> to vector<8x8xf32>
    %88 = vector.extract_strided_slice %84 {offsets = [0, 24], sizes = [8, 8], strides = [1, 1]} : vector<8x32xf32> to vector<8x8xf32>
    %89 = tpu.concatenate %85, %86, %87, %88 in 0 : vector<8x8xf32>, vector<8x8xf32>, vector<8x8xf32>, vector<8x8xf32> -> vector<32x8xf32>
    %c0_22 = arith.constant 0 : index
    %c0_23 = arith.constant 0 : index
    %90 = vector.load %arg10[%c0_22, %c0_23] : memref<32x8xf32, #tpu.memory_space<vmem>>, vector<32x8xf32>
    tpu.vector_store %arg10[%c0_22, %c0_23], %89 {strides = array<i32>} : memref<32x8xf32, #tpu.memory_space<vmem>>, vector<32x8xf32>,
    %c0_24 = arith.constant 0 : index
    %c0_25 = arith.constant 0 : index
    %91 = tpu.strided_load %arg10[%c0_24, %c0_25] {strides = array<i32: 4, 1>} : memref<32x8xf32, #tpu.memory_space<vmem>>, vector<8x8xf32>
    %c1 = arith.constant 1 : index
    %c0_26 = arith.constant 0 : index
    %92 = tpu.strided_load %arg10[%c1, %c0_26] {strides = array<i32: 4, 1>} : memref<32x8xf32, #tpu.memory_space<vmem>>, vector<8x8xf32>
    %c2 = arith.constant 2 : index
    %c0_27 = arith.constant 0 : index
    %93 = tpu.strided_load %arg10[%c2, %c0_27] {strides = array<i32: 4, 1>} : memref<32x8xf32, #tpu.memory_space<vmem>>, vector<8x8xf32>
    %c3 = arith.constant 3 : index
    %c0_28 = arith.constant 0 : index
    %94 = tpu.strided_load %arg10[%c3, %c0_28] {strides = array<i32: 4, 1>} : memref<32x8xf32, #tpu.memory_space<vmem>>, vector<8x8xf32>
    %95 = tpu.concatenate %91, %92, %93, %94 in 1 : vector<8x8xf32>, vector<8x8xf32>, vector<8x8xf32>, vector<8x8xf32> -> vector<8x32xf32>
    %96 = arith.truncf %95 : vector<8x32xf32> to vector<8x32xbf16>
    %c0_29 = arith.constant 0 : index
    %c0_30 = arith.constant 0 : index
    %97 = vector.load %arg7[%c0_29, %c0_30] : memref<32x32xbf16, #tpu.memory_space<vmem>>, vector<32x32xbf16>
    %cst_31 = arith.constant dense<0.000000e+00> : vector<8x32xf32>
    %98 = tpu.matmul %96, %97, %cst_31 {dimension_numbers = #tpu.dot_dimension_numbers<[1], [0], [0], [1], [0, 0, 1, 1], [], []>} : vector<8x32xbf16>, vector<32x32xbf16>, vector<8x32xf32> -> vector<8x32xf32>
    %c0_32 = arith.constant 0 : index
    %c0_33 = arith.constant 0 : index
    %99 = vector.load %arg8[%c0_32, %c0_33] : memref<1x32xf32, #tpu.memory_space<vmem>>, vector<1x32xf32>
    %100 = vector.broadcast %99 : vector<1x32xf32> to vector<8x32xf32>
    %101 = arith.addf %98, %100 : vector<8x32xf32>
    %c0_34 = arith.constant 0 : index
    %c0_35 = arith.constant 0 : index
    %102 = vector.load %arg9[%c0_34, %c0_35] : memref<8x32xf32, #tpu.memory_space<vmem>>, vector<8x32xf32>
    tpu.vector_store %arg9[%c0_34, %c0_35], %101 {strides = array<i32>} : memref<8x32xf32, #tpu.memory_space<vmem>>, vector<8x32xf32>,
    return
  }
  func.func @transform_0(%arg0: i32) -> (i32, i32) {
    %c0_i32 = arith.constant 0 : i32
    %c0_i32_0 = arith.constant 0 : i32
    return %arg0, %c0_i32 : i32, i32
  }
  func.func @transform_1(%arg0: i32) -> (i32, i32) {
    %c0_i32 = arith.constant 0 : i32
    %c0_i32_0 = arith.constant 0 : i32
    %c0_i32_1 = arith.constant 0 : i32
    return %c0_i32, %c0_i32_0 : i32, i32
  }
  func.func @transform_2(%arg0: i32) -> (i32, i32) {
    %c0_i32 = arith.constant 0 : i32
    %c0_i32_0 = arith.constant 0 : i32
    %c0_i32_1 = arith.constant 0 : i32
    return %c0_i32, %c0_i32_0 : i32, i32
  }
  func.func @transform_3(%arg0: i32) -> (i32, i32) {
    %c0_i32 = arith.constant 0 : i32
    %c0_i32_0 = arith.constant 0 : i32
    %c0_i32_1 = arith.constant 0 : i32
    return %c0_i32, %c0_i32_0 : i32, i32
  }
  func.func @transform_4(%arg0: i32) -> (i32, i32) {
    %c0_i32 = arith.constant 0 : i32
    %c0_i32_0 = arith.constant 0 : i32
    %c0_i32_1 = arith.constant 0 : i32
    return %c0_i32, %c0_i32_0 : i32, i32
  }
  func.func @transform_5(%arg0: i32) -> (i32, i32) {
    %c0_i32 = arith.constant 0 : i32
    %c0_i32_0 = arith.constant 0 : i32
    %c0_i32_1 = arith.constant 0 : i32
    return %c0_i32, %c0_i32_0 : i32, i32
  }
  func.func @transform_6(%arg0: i32) -> (i32, i32) {
    %c0_i32 = arith.constant 0 : i32
    %c0_i32_0 = arith.constant 0 : i32
    %c0_i32_1 = arith.constant 0 : i32
    return %c0_i32, %c0_i32_0 : i32, i32
  }
  func.func @transform_7(%arg0: i32) -> (i32, i32) {
    %c0_i32 = arith.constant 0 : i32
    %c0_i32_0 = arith.constant 0 : i32
    %c0_i32_1 = arith.constant 0 : i32
    return %c0_i32, %c0_i32_0 : i32, i32
  }
  func.func @transform_8(%arg0: i32) -> (i32, i32) {
    %c0_i32 = arith.constant 0 : i32
    %c0_i32_0 = arith.constant 0 : i32
    return %arg0, %c0_i32 : i32, i32
  }
}

</mosaic_0001>

<bundles_post_ra>
// kernel: tpu_custom_call.1
= control target key start
LH: loop header
LB: loop body
LE: loop exit
PB: predicated region body
PF: predicated region fallthrough
CT: control target
= control target key end

     0   :  { %13 = vsyncpa [#allocation4], 0  ;;  %s1554_s0 = inlined_call_operand.vmem [shape: f32[16,32], index: 0, kind: input, shape index: {}]   ;;  %s1555_s1 = inlined_call_operand.vmem [shape: bf16[32,96], index: 1, kind: input, shape index: {}]   ;;  %s1556_s2 = inlined_call_operand.vmem [shape: f32[1,96], index: 2, kind: input, shape index: {}]   ;;  %s1557_s3 = inlined_call_operand.vmem [shape: bf16[128,16], index: 3, kind: input, shape index: {}]   ;;  %s1558_s4 = inlined_call_operand.vmem [shape: bf16[16,128], index: 4, kind: input, shape index: {}]   ;;  %s1559_s5 = inlined_call_operand.vmem [shape: bf16[128,32], index: 5, kind: input, shape index: {}]   ;;  %s1560_s6 = inlined_call_operand.vmem [shape: bf16[32,32], index: 6, kind: input, shape index: {}]   ;;  %s1561_s7 = inlined_call_operand.vmem [shape: f32[1,32], index: 7, kind: input, shape index: {}]   ;;  %s1562_s8 = inlined_call_operand.hbm [shape: f32[16,32], index: 8, kind: output, shape index: {}]  }
   0x1   :  { %15 = vsyncpa [#allocation4 + $0x1], 0  ;;  %s1296_s27 = smov 0   ;;  %s1298_s28 = smov 0  }
   0x2   :  { %s1300_s29 = smov 0   ;;  %s1302_s30 = smov 0  }
   0x3 LB: > { %s1317_s9 = sadd.s32 4294967295, %s1229_s30   ;;  %s948_s10 = sadd.s32 4294967294, %s1229_s30   ;;  %s1229_s30 = sphi %s1302_s30, %s1568_s30   ;;  %s1225_s29 = sphi %s1300_s29, %s1567_s29   ;;  %s1221_s28 = sphi %s1298_s28, %s1566_s28   ;;  %s1217_s27 = sphi %s1296_s27, %s1565_s27  }
   0x4   : > { %s1321_s11 = sadd.s32 1, %s1229_s30   ;;  %s201_s12 = sadd.s32 1, %s1225_s29 }
   0x5   : > { %s198_s13 = ssub.s32 %s1229_s30, %s1321_s11  ;;  %p211_p0 = scmp.ne.s32.totalorder %s1225_s29, %s1221_s28 }
   0x6   : > { %p199_p1 = scmp.eq.s32.totalorder %s198_s13, 0  ;;  %p212_p2 = scmp.eq.s32.totalorder %s1317_s9, 1 }
   0x7   : > { %p217_p3 = scmp.ne.s32.totalorder %s1221_s28, %s1217_s27  ;;  %p218_p4 = scmp.eq.s32.totalorder %s948_s10, 1 }
   0x8   : > { %s1332_s14 = scalar_select %p199_p1, %s1225_s29, %s201_s12  }
   0x9   : > { %p1334_p5 = por %p212_p2, %p211_p0  ;;  %p1338_p6 = por %p218_p4, %p217_p3 }
   0xa   : > { %p951_p7 = scmp.ge.s32.totalorder %s1229_s30, 1  ;;  %p264_p8 = scmp.lt.s32.totalorder %s1229_s30, 3 }
   0xc   : > { %p265_p9 = pnand %p951_p7, %p264_p8 }
   0xd   : > { %v1130_v0 = vld [vmem:[%s1555_s1] sm:$0xff] (!%p265_p9)   ;;  %v1231_v1 = vmov (!%p265_p9), 0.0   ;;  %v1131_v2 = vld [vmem:[%s1555_s1 + $0x8] sm:$0xff] (!%p265_p9)   ;;  %vm1232_vm0 = vmmov (!%p265_p9), 0   ;;  %p297_p10 = scmp.lt.s32.totalorder (!%p265_p9), %s1317_s9, 1  ;;  %vm327_vm1 = vcmask (!%p265_p9), 261120  }
   0xe   : > { %268 = sbr.rel (%p265_p9) target bundleno = 1940 (0x794), region = 52  ;;  %1010 = vmatprep.subr.bf16.mxu0 (!%p265_p9), %v1231_v1  ;;  %1018 = vmatprep.subr.bf16.mxu1 (!%p265_p9), %v1231_v1  ;;  %v1132_v5 = vld [vmem:[%s1557_s3] sm:$0xff] (!%p265_p9)   ;;  %v1133_v6 = vld [vmem:[%s1557_s3 + $0x8] sm:$0xff] (!%p265_p9)   ;;  %v1134_v7 = vld [vmem:[%s1557_s3 + $0x10] sm:$0xff] (!%p265_p9)   ;;  %s1234_s26 = smov (!%p265_p9), 8   ;;  %vm408_vm2 = vcmask (!%p265_p9), 64512  }
   0xf   : > { %1011 = vmatpush3.bf16.msra.mxu0 (!%p265_p9), %v1130_v0  ;;  %1014 = vmatprep.mubr.msk.bf16.mxu0 (!%p265_p9), %vm1232_vm0, %v1231_v1  ;;  %v1135_v8 = vld [vmem:[%s1557_s3 + $0x18] sm:$0xff] (!%p265_p9)   ;;  %v954_v9 = vld [vmem:[%s1556_s2] ss:$0 sm:$0xff] (!%p265_p9)  ;;  %v1137_v16 = vld [vmem:[%s1557_s3 + $0x28] sm:$0xff] (!%p265_p9)   ;;  %s1235_s13 = smov (!%p265_p9), 32   ;;  %s1236_s17 = smov (!%p265_p9), 16  }
  0x10   : > { %1012 = vmatprep.subr.bf16.mxu0 (!%p265_p9), %v1231_v1  ;;  %1034 = vmatprep.mubr.msk.bf16.mxu1 (!%p265_p9), %vm1232_vm0, %v1231_v1  ;;  %v1136_v11 = vld [vmem:[%s1557_s3 + $0x20] sm:$0xff] (!%p265_p9)   ;;  %v1138_v17 = vld [vmem:[%s1557_s3 + $0x30] sm:$0xff] (!%p265_p9)   ;;  %s1237_s20 = smov (!%p265_p9), 48   ;;  %v1139_v18 = vld [vmem:[%s1557_s3 + $0x38] sm:$0xff] (!%p265_p9)   ;;  %s1239_s24 = smov (!%p265_p9), 64   ;;  %vm410_vm3 = vcmask (!%p265_p9), 130048  }
  0x11   : > { %1019 = vmatpush3.bf16.msra.mxu1 (!%p265_p9), %v1132_v5  ;;  %s1240_s10 = smov (!%p265_p9), 56   ;;  %s1241_s12 = smov (!%p265_p9), 80   ;;  %vm412_vm4 = vcmask (!%p265_p9), 195584   ;;  %vm415_vm5 = vcmask (!%p265_p9), 326656   ;;  %vm417_vm6 = vcmask (!%p265_p9), 392192   ;;  %vm419_vm7 = vcmask (!%p265_p9), 457728  }
  0x12   : > { %1020 = vmatprep.subr.bf16.mxu1 (!%p265_p9), %v1231_v1  ;;  %s1243_s18 = smov (!%p265_p9), 88   ;;  %s1244_s19 = smov (!%p265_p9), 96   ;;  %vm421_vm8 = vcmask (!%p265_p9), 523264   ;;  %vm423_vm9 = vcmask (!%p265_p9), 588800   ;;  %vm425_vm10 = vcmask (!%p265_p9), 654336   ;;  %vm427_vm11 = vcmask (!%p265_p9), 719872  }
  0x13   : > { %1013 = vmatpush3.bf16.msra.mxu0 (!%p265_p9), %v1131_v2  ;;  %vm429_vm12 = vcmask (!%p265_p9), 785408   ;;  %vm431_vm13 = vcmask (!%p265_p9), 850944   ;;  %vm433_vm14 = vcmask (!%p265_p9), 916480   ;;  %vm435_vm15 = vcmask (!%p265_p9), 982016   ;;  %s1248_s23 = smov (!%p265_p9), 112  }
  0x14   : > { %1038 = vmatprep.subr.bf16.mxu0 (!%p265_p9), %v1231_v1 }
  0x15   : > { %s298_s21 = scalar_select %p297_p10, %s1317_s9, 1  ;;  %1021 = vmatpush3.bf16.msra.mxu1 %v1133_v6 }
  0x16   : > { %1022 = vmatprep.subr.bf16.mxu1 %v1231_v1 }
  0x17   : > { %s953_s22 = sshll.u32 %s298_s21, 3  ;;  %s1238_s21 = smov 40  }
  0x18   : > { %s300_s25 = scalar_lea.vmem %s1554_s0, %s953_s22  ;;  %s1247_s22 = smov 116  }
  0x19   : > { %v302_v3 = vld [vmem:[%s300_s25] sm:$0xff]  ;;  %1023 = vmatpush3.bf16.msra.mxu1 %v1134_v7  ;;  %s1233_s25 = smov 24  }
  0x1a   : > { %v303_v4 = vpack.c.bf16 %v302_v3, %v302_v3  ;;  %1024 = vmatprep.subr.bf16.mxu1 %v1231_v1 }
  0x1c   : > { %1015 = vmatmul.mubr.msk.bf16.vlgmr.msra.gmra.mrb[0].mxu0 %vm327_vm1, %v303_v4 }
  0x1d   : > { %1040 = vmatprep.mubr.msk.bf16.mxu0 %vm1232_vm0, %v1231_v1  ;;  %1025 = vmatpush3.bf16.msra.mxu1 %v1135_v8 }
  0x1e   : > { %1026 = vmatprep.subr.bf16.mxu1 %v1231_v1 }
  0x21   : > { %1027 = vmatpush3.bf16.msra.mxu1 %v1136_v11 }
  0x22   : > { %1028 = vmatprep.subr.bf16.mxu1 %v1231_v1 }
  0x25   : > { %1029 = vmatpush3.bf16.msra.mxu1 %v1137_v16 }
  0x26   : > { %1030 = vmatprep.subr.bf16.mxu1 %v1231_v1 }
  0x29   : > { %1031 = vmatpush3.bf16.msra.mxu1 %v1138_v17 }
  0x2a   : > { %1032 = vmatprep.subr.bf16.mxu1 %v1231_v1 }
  0x2d   : > { %1033 = vmatpush3.bf16.msra.mxu1 %v1139_v18 }
  0x2e   : > { %1064 = vmatprep.subr.bf16.mxu1 %v1231_v1 }
  0xef   : > { %v365_v10 = vpop.f32.mrb[0].mxu0 }
  0xf0   : > { %v1388_v12 = vadd.f32 %v954_v9, %v365_v10  ;;  %v1016_v13 = vpop.f32.mrb[1].mxu0 }
  0xf1   : > { %v368_v14 = vpop.f32.mrb[2].mxu0 }
  0xf2   : > { %378 = vrot.lane.b32.xlu1 %v1388_v12, %s1233_s25  ;;  %372 = vrot.lane.b32.xlu0 %v1388_v12, %s1234_s26  ;;  %v1017_v15 = vpop.f32.mrb[3].mxu0 }
  0xf6   : > { %381 = vrot.lane.b32.xlu1 %v1388_v12, %s1235_s13  ;;  %375 = vrot.lane.b32.xlu0 %v1388_v12, %s1236_s17  ;;  %s1242_s13 = smov 72  }
  0xfa   : > { %387 = vrot.lane.b32.xlu1 %v1388_v12, %s1237_s20  ;;  %384 = vrot.lane.b32.xlu0 %v1388_v12, %s1238_s21  ;;  %s1245_s20 = smov 120   ;;  %s1246_s21 = smov 124  }
  0xfe   : > { %393 = vrot.lane.b32.xlu1 %v1388_v12, %s1239_s24  ;;  %390 = vrot.lane.b32.xlu0 %v1388_v12, %s1240_s10 }
 0x102   : > { %399 = vrot.lane.b32.xlu1 %v1388_v12, %s1241_s12  ;;  %396 = vrot.lane.b32.xlu0 %v1388_v12, %s1242_s13  ;;  %s1249_s12 = smov 104   ;;  %s1250_s13 = smov [#allocation3]  }
 0x106   : > { %402 = vrot.lane.b32.xlu1 %v1388_v12, %s1243_s18  ;;  %405 = vrot.lane.b32.xlu0 %v1388_v12, %s1244_s19  ;;  %s1171_s18 = sshll.u32 %s1250_s13, 4  ;;  %s1172_s18 = int_to_ptr.vmem [resolvable:$false] %s1171_s18 }
 0x164   : > { %v379_v19 = vpop.permute.xlu1 %378  ;;  %v373_v20 = vpop.permute.xlu0 %372 }
 0x165   : > { %v409_v21 = vsel %vm408_vm2, %v1388_v12, %v373_v20 }
 0x168   : > { %v382_v22 = vpop.permute.xlu1 %381  ;;  %v376_v23 = vpop.permute.xlu0 %375 }
 0x169   : > { %v411_v24 = vsel %vm410_vm3, %v409_v21, %v376_v23 }
 0x16a   : > { %v413_v25 = vsel %vm412_vm4, %v411_v24, %v379_v19 }
 0x16b   : > { %v414_v26 = vsel %vm327_vm1, %v413_v25, %v379_v19 }
 0x16c   : > { %v388_v27 = vpop.permute.xlu1 %387  ;;  %v416_v28 = vsel %vm415_vm5, %v414_v26, %v382_v22  ;;  %v385_v29 = vpop.permute.xlu0 %384  ;;  %vm574_vm5 = vcmask 97344  }
 0x16d   : > { %v418_v30 = vsel %vm417_vm6, %v416_v28, %v385_v29  ;;  %vm558_vm6 = vcmask 64544  }
 0x16e   : > { %v420_v31 = vsel %vm419_vm7, %v418_v30, %v388_v27  ;;  %vm590_vm7 = vcmask 130144  }
 0x16f   : > { %v422_v32 = vsel %vm421_vm8, %v420_v31, %v388_v27 }
 0x170   : > { %v394_v33 = vpop.permute.xlu1 %393  ;;  %v391_v34 = vpop.permute.xlu0 %390 }
 0x171   : > { %v424_v35 = vsel %vm423_vm9, %v422_v32, %v391_v34  ;;  %vm608_vm9 = vcmask 97280  }
 0x172   : > { %v426_v37 = vsel %vm425_vm10, %v424_v35, %v394_v33 }
 0x174   : > { %v400_v36 = vpop.permute.xlu1 %399  ;;  %v397_v38 = vpop.permute.xlu0 %396 }
 0x175   : > { %v428_v39 = vsel %vm427_vm11, %v426_v37, %v397_v38 }
 0x176   : > { %v430_v40 = vsel %vm429_vm12, %v428_v39, %v397_v38  ;;  %v1141_v38 = vld [vmem:[%s1559_s5] sm:$0xff]  }
 0x177   : > { %v432_v41 = vsel %vm431_vm13, %v430_v40, %v400_v36  ;;  %v1142_v40 = vld [vmem:[%s1559_s5 + $0x8] sm:$0xff]  }
 0x178   : > { %v403_v42 = vpop.permute.xlu1 %402  ;;  %v406_v43 = vpop.permute.xlu0 %405 }
 0x179   : > { %v434_v44 = vsel %vm433_vm14, %v432_v41, %v403_v42  ;;  %v437_v45 = vsel %vm327_vm1, %v406_v43, %v1388_v12  ;;  %v662_v46 = vsel %vm327_vm1, %v394_v33, %v406_v43  ;;  %v1143_v41 = vld [vmem:[%s1559_s5 + $0x10] sm:$0xff]   ;;  %v1144_v42 = vld [vmem:[%s1559_s5 + $0x18] sm:$0xff]  }
 0x17a   : > { %v436_v47 = vsel %vm435_vm15, %v434_v44, %v406_v43  ;;  %v438_v48 = vsel %vm421_vm8, %v437_v45, %v382_v22  ;;  %v663_v49 = vsel %vm421_vm8, %v662_v46, %v1388_v12  ;;  %vm546_vm8 = vcmask 31744   ;;  %v1145_v43 = vld [vmem:[%s1559_s5 + $0x20] sm:$0xff]   ;;  %v1146_v44 = vld [vmem:[%s1559_s5 + $0x28] sm:$0xff]   ;;  %v1147_v45 = vld [vmem:[%s1559_s5 + $0x30] sm:$0xff]  }
 0x17b   : > { %v439_v50 = vsel %vm429_vm12, %v438_v48, %v394_v33  ;;  %v1433_v51 = vsel %vm429_vm12, %v663_v49, %v382_v22  ;;  %v1140_v22 = vld [vmem:[%s1558_s4] sm:$0xff]   ;;  %v1148_v46 = vld [vmem:[%s1559_s5 + $0x38] sm:$0xff]  }
 0x17c   : > { %v440_v52 = vmul.f32 %v439_v50, %v436_v47  ;;  %1039 = vmatpush3.bf16.msra.mxu0 %v1140_v22 }
 0x17d   : > { %1044 = vmatprep.subr.bf16.mxu0 %v1231_v1 }
 0x17e   : > { %v441_v53 = vpack.c.bf16 %v440_v52, %v440_v52 }
 0x180   : > { %1035 = vmatmul.mubr.bf16.vlgmr.msra.gmra.mrb[0].mxu1 %v441_v53 }
 0x181   : > { %1068 = vmatprep.mubr.msk.bf16.mxu1 %vm1232_vm0, %v1231_v1 }
 0x253   : > { %v540_v54 = vpop.f32.mrb[0].mxu1 }
 0x254   : > { %v1036_v55 = vpop.f32.mrb[1].mxu1  ;;  %v575_v56 = vsel %vm574_vm5, %v540_v54, -inf  ;;  %v559_v57 = vsel %vm558_vm6, %v540_v54, -inf  ;;  %v591_v60 = vsel %vm590_vm7, %v540_v54, -inf  ;;  %v547_v61 = vsel %vm546_vm8, %v540_v54, -inf }
 0x255   : > { %576 = vmax.xlane.f32.xlu1 %v575_v56  ;;  %560 = vmax.xlane.f32.xlu0 %v559_v57  ;;  %v543_v58 = vpop.f32.mrb[2].mxu1 }
 0x256   : > { %v1037_v59 = vpop.f32.mrb[3].mxu1  ;;  %v1149_v58 = vld [vmem:[%s1560_s6] sm:$0xff]  }
 0x257   : > { %1065 = vmatpush3.bf16.msra.mxu1 %v1149_v58 }
 0x258   : > { %1066 = vmatprep.subr.bf16.mxu1 %v1231_v1 }
 0x259   : > { %592 = vmax.xlane.f32.xlu0 %v591_v60  ;;  %v1150_v60 = vld [vmem:[%s1560_s6 + $0x8] sm:$0xff]  }
 0x25b   : > { %1067 = vmatpush3.bf16.msra.mxu1 %v1150_v60 }
 0x25d   : > { %548 = vmax.xlane.f32.xlu0 %v547_v61 }
 0x2e2   : > { %v577_v62 = vpop.xlane.xlu1 %576  ;;  %v561_v63 = vpop.xlane.xlu0 %560 }
 0x2e3   : > { %v578_v0 = vsub.f32 %v540_v54, %v577_v62  ;;  %v562_v2 = vsub.f32 %v540_v54, %v561_v63 }
 0x2e5   : > { %v579_v3 = vmul.f32 1.442695, %v578_v0  ;;  %v563_v4 = vmul.f32 1.442695, %v562_v2 }
 0x2e6   : > { %v593_v5 = vpop.xlane.xlu0 %592 }
 0x2e7   : > { %1151 = vpow2.f32 %v579_v3  ;;  %v594_v6 = vsub.f32 %v540_v54, %v593_v5 }
 0x2e8   : > { %1153 = vpow2.f32 %v563_v4 }
 0x2e9   : > { %v595_v7 = vmul.f32 1.442695, %v594_v6 }
 0x2ea   : > { %v549_v11 = vpop.xlane.xlu0 %548 }
 0x2eb   : > { %1155 = vpow2.f32 %v595_v7  ;;  %v550_v12 = vsub.f32 %v540_v54, %v549_v11 }
 0x2ed   : > { %v551_v13 = vmul.f32 1.442695, %v550_v12 }
 0x2ef   : > { %1157 = vpow2.f32 %v551_v13 }
 0x2f1   : > { %v1152_v8 = vpop.eup %1151 }
 0x2f2   : > { %v1154_v9 = vpop.eup %1153  ;;  %582 = vrot.lane.b32.xlu0 %v1152_v8, %s1245_s20 }
 0x2f3   : > { %566 = vrot.lane.b32.xlu1 %v1154_v9, %s1246_s21 }
 0x2f5   : > { %v1156_v10 = vpop.eup %1155 }
 0x2f7   : > { %598 = vrot.lane.b32.xlu1 %v1156_v10, %s1247_s22 }
 0x2f9   : > { %v1158_v14 = vpop.eup %1157 }
 0x2fa   : > { %v553_v15 = vsel %vm546_vm8, %v1158_v14, 0.0 }
 0x31b   : > { %554 = vadd.xlane.f32.xlu1 %v553_v15 }
 0x364   : > { %v583_v18 = vpop.permute.xlu0 %582 }
 0x365   : > { %v567_v16 = vpop.permute.xlu1 %566  ;;  %v585_v21 = vsel %vm546_vm8, %v583_v18, 0.0 }
 0x366   : > { %v569_v17 = vsel %vm546_vm8, %v567_v16, 0.0 }
 0x367   : > { %570 = vadd.xlane.f32.xlu0 %v569_v17 }
 0x369   : > { %v599_v19 = vpop.permute.xlu1 %598 }
 0x36a   : > { %v601_v20 = vsel %vm546_vm8, %v599_v19, 0.0 }
 0x36b   : > { %602 = vadd.xlane.f32.xlu1 %v601_v20  ;;  %586 = vadd.xlane.f32.xlu0 %v585_v21 }
 0x3a8   : > { %v555_v23 = vpop.xlane.xlu1 %554 }
 0x3f4   : > { %v571_v24 = vpop.xlane.xlu0 %570 }
 0x3f5   : > { %1159 = vrcp.f32 %v571_v24 }
 0x3f6   : > { %1161 = vrcp.f32 %v555_v23 }
 0x3f8   : > { %v603_v25 = vpop.xlane.xlu1 %602  ;;  %v587_v26 = vpop.xlane.xlu0 %586 }
 0x3f9   : > { %1163 = vrcp.f32 %v603_v25 }
 0x3fa   : > { %1165 = vrcp.f32 %v587_v26 }
 0x3ff   : > { %v1160_v27 = vpop.eup %1159 }
 0x400   : > { %v1162_v28 = vpop.eup %1161  ;;  %v573_v29 = vmul.f32 %v1160_v27, %v1154_v9  ;;  %v976_v9 = vld [vmem:[%s1561_s7] ss:$0 sm:$0xff] }
 0x401   : > { %v557_v32 = vmul.f32 %v1162_v28, %v1158_v14 }
 0x403   : > { %v1164_v30 = vpop.eup %1163  ;;  %v606_v35 = vsel %vm546_vm8, %v557_v32, %v573_v29 }
 0x404   : > { %v1166_v31 = vpop.eup %1165  ;;  %v605_v33 = vmul.f32 %v1164_v30, %v1156_v10 }
 0x405   : > { %v589_v34 = vmul.f32 %v1166_v31, %v1152_v8 }
 0x407   : > { %v607_v36 = vsel %vm408_vm2, %v606_v35, %v589_v34 }
 0x408   : > { %v609_v37 = vsel %vm608_vm9, %v607_v36, %v605_v33 }
 0x409   : > { %v610_v39 = vpack.c.bf16 %v609_v37, %v609_v37 }
 0x40b   : > { %1041 = vmatmul.mubr.msk.bf16.vlgmr.msra.gmra.mrb[4].mxu0 %vm410_vm3, %v610_v39 }
 0x40c   : > { %1045 = vmatpush3.bf16.msra.mxu0 %v1141_v38  ;;  %1060 = vmatprep.mubr.msk.bf16.mxu0 %vm1232_vm0, %v1231_v1 }
 0x40d   : > { %1046 = vmatprep.subr.bf16.mxu0 %v1231_v1 }
 0x410   : > { %1047 = vmatpush3.bf16.msra.mxu0 %v1142_v40 }
 0x411   : > { %1048 = vmatprep.subr.bf16.mxu0 %v1231_v1 }
 0x414   : > { %1049 = vmatpush3.bf16.msra.mxu0 %v1143_v41 }
 0x415   : > { %1050 = vmatprep.subr.bf16.mxu0 %v1231_v1 }
 0x418   : > { %1051 = vmatpush3.bf16.msra.mxu0 %v1144_v42 }
 0x419   : > { %1052 = vmatprep.subr.bf16.mxu0 %v1231_v1 }
 0x41c   : > { %1053 = vmatpush3.bf16.msra.mxu0 %v1145_v43 }
 0x41d   : > { %1054 = vmatprep.subr.bf16.mxu0 %v1231_v1 }
 0x420   : > { %1055 = vmatpush3.bf16.msra.mxu0 %v1146_v44 }
 0x421   : > { %1056 = vmatprep.subr.bf16.mxu0 %v1231_v1 }
 0x424   : > { %1057 = vmatpush3.bf16.msra.mxu0 %v1147_v45 }
 0x425   : > { %1058 = vmatprep.subr.bf16.mxu0 %v1231_v1 }
 0x428   : > { %1059 = vmatpush3.bf16.msra.mxu0 %v1148_v46 }
 0x4de   : > { %v656_v47 = vpop.f32.mrb[4].mxu0 }
 0x4df   : > { %v665_v48 = vmul.f32 %v1433_v51, %v656_v47  ;;  %v1042_v49 = vpop.f32.mrb[5].mxu0 }
 0x4e0   : > { %v659_v50 = vpop.f32.mrb[6].mxu0 }
 0x4e1   : > { %v666_v52 = vpack.c.bf16 %v665_v48, %v665_v48  ;;  %v1043_v53 = vpop.f32.mrb[7].mxu0 }
 0x4e3   : > { %1061 = vmatmul.mubr.bf16.vlgmr.msra.gmra.mrb[8].mxu0 %v666_v52 }
 0x5b6   : > { %v765_v54 = vpop.f32.mrb[8].mxu0 }
 0x5b7   : > { %781 = vst.msk [vmem:[#allocation2] sm:$0xff] %vm408_vm2, %v765_v54  ;;  %775 = vrot.lane.b32.xlu1 %v765_v54, %s1248_s23  ;;  %772 = vrot.lane.b32.xlu0 %v765_v54, %s1245_s20  ;;  %v1062_v55 = vpop.f32.mrb[9].mxu0 }
 0x5b8   : > { %v768_v56 = vpop.f32.mrb[10].mxu0 }
 0x5b9   : > { %v1063_v57 = vpop.f32.mrb[11].mxu0 }
 0x5bb   : > { %778 = vrot.lane.b32.xlu1 %v765_v54, %s1249_s12 }
 0x629   : > { %v776_v51 = vpop.permute.xlu1 %775  ;;  %v773_v59 = vpop.permute.xlu0 %772 }
 0x62a   : > { %783 = vst.msk [vmem:[#allocation2 + $0x10] sm:$0xff] %vm408_vm2, %v776_v51  ;;  %782 = vst.msk [vmem:[#allocation2 + $0x8] sm:$0xff] %vm408_vm2, %v773_v59 }
 0x62d   : > { %v779_v61 = vpop.permute.xlu1 %778 }
 0x62e   : > { %784 = vst.msk [vmem:[#allocation2 + $0x18] sm:$0xff] %vm408_vm2, %v779_v61 }
 0x635   : > { %v789_v62 = vld [vmem:[#allocation2 + $0x2] ss:$4 sm:$0xff]  ;;  %v787_v63 = vld [vmem:[#allocation2 + $0x1] ss:$4 sm:$0xff]  ;;  %v791_v1 = vld [vmem:[#allocation2 + $0x3] ss:$4 sm:$0xff] }
 0x636   : > { %797 = vrot.lane.b32.xlu1 %v789_v62, %s1236_s17  ;;  %793 = vrot.lane.b32.xlu0 %v787_v63, %s1234_s26  ;;  %v785_v2 = vld [vmem:[#allocation2] ss:$4 sm:$0xff]  ;;  %s294_s17 = sand.u32 1, %s1221_s28  }
 0x637   : > { %s952_s20 = sshll.u32 %s294_s17, 3 }
 0x638   : > { %s296_s21 = scalar_lea.vmem [#allocation3], %s952_s20  ;;  %s1173_s20 = scalar_lea.vmem %s1172_s18, 256 }
 0x639   : > { %s889_s22 = sshll.u32 %s296_s21, 4  ;;  %s1513_s22 = int_to_ptr.vmem [resolvable:$true] %s889_s22 }
 0x63a   : > { %801 = vrot.lane.b32.xlu0 %v791_v1, %s1233_s25  ;;  %s981_s25 = sshll.u32 %s1317_s9, 7  ;;  %s876_s9 = scalar_lea.sflag [#allocation4], %s294_s17 }
 0x63b   : > { %s1511_s10 = scalar_lea.hbm %s1562_s8, %s981_s25  ;;  %s1167_s12 = scalar_lea.vmem %s1513_s22, 128 }
 0x63c   : > { %p1168_p11 = scmp.ne.s32.totalorder %s1513_s22, %s1167_s12  ;;  %p1174_p0 = scmp.lt.s32.totalorder %s1513_s22, %s1172_s18 }
 0x63d   : > { %p1175_p1 = scmp.lt.s32.totalorder %s1173_s20, %s1167_s12 }
 0x63e   : > { %p1169_p12 = pnand %p1168_p11, %p1334_p5 }
 0x63f   : > { %p1176_p2 = por %p1175_p1, %p1174_p0 }
 0x640   : > { %p1170_p13 = pneg %p1169_p12 }
 0x642   : > { %p1177_p3 = pnand %p1176_p2, %p1170_p13 }
 0x6a8   : > { %v794_v0 = vpop.permute.xlu0 %793  ;;  %v798_v3 = vpop.permute.xlu1 %797 }
 0x6a9   : > { %v804_v4 = vsel %vm408_vm2, %v785_v2, %v794_v0 }
 0x6aa   : > { %v805_v6 = vsel %vm410_vm3, %v804_v4, %v798_v3 }
 0x6ac   : > { %v802_v5 = vpop.permute.xlu0 %801 }
 0x6ad   : > { %v806_v7 = vsel %vm412_vm4, %v805_v6, %v802_v5 }
 0x6ae   : > { %v807_v8 = vpack.c.bf16 %v806_v7, %v806_v7 }
 0x6b0   : > { %1069 = vmatmul.mubr.msk.bf16.vlgmr.msra.gmra.mrb[4].mxu1 %vm327_vm1, %v807_v8 }
 0x783   : > { %v868_v10 = vpop.f32.mrb[4].mxu1 }
 0x784   : > { %v869_v11 = vadd.f32 %v976_v9, %v868_v10  ;;  %v1070_v12 = vpop.f32.mrb[5].mxu1 }
 0x785   : > { %v871_v13 = vpop.f32.mrb[6].mxu1 }
 0x786   : > { %v1071_v14 = vpop.f32.mrb[7].mxu1  ;;  %874 = vst.msk [vmem:[%s296_s21] sm:$0xff] %vm327_vm1, %v869_v11 }
 0x787   : > { %1180 = shalt.err (!%p1177_p3)
}
 0x788   : > { %s1181_s17 = scalar_lea.hbm %s1511_s10, 128  ;;  %s1185_s25 = scalar_lea.hbm %s1562_s8, 256 }
 0x789   : > { %p1182_p4 = scmp.ne.s32.totalorder %s1511_s10, %s1181_s17  ;;  %p1186_p9 = scmp.lt.u32.totalorder %s1511_s10, %s1562_s8 }
 0x78a   : > { %p1187_p10 = scmp.lt.u32.totalorder %s1185_s25, %s1181_s17  ;;  %p1189_p12 = scmp.lt.u32.totalorder %s1181_s17, %s1511_s10 }
 0x78b   : > { %p1183_p7 = pnand %p1182_p4, %p1334_p5 }
 0x78c   : > { %p1188_p11 = por %p1187_p10, %p1186_p9 }
 0x78d   : > { %p1184_p8 = pneg %p1183_p7 }
 0x78e   : > { %p1190_p13 = por %p1189_p12, %p1188_p11 }
 0x790   : > { %p1191_p0 = pnand %p1190_p13, %p1184_p8 }
 0x792   : > { %1194 = shalt.err (!%p1191_p0)
}
 0x793   : > { %1072 = dma.vmem_to_hbm [thread:$0]  (%p1334_p5), %s1513_s22, 128, %s1511_s10, %s876_s9  }
 0x794 PF: > { %p1078_p1 = scmp.ge.s32.totalorder %s1229_s30, 2  ;;  %s901_s24 = sand.u32 1, %s1217_s27  }
 0x795   : > { %s902_s12 = scalar_lea.sflag [#allocation4], %s901_s24 }
 0x796   : > { %p1075_p2 = pnand %p1078_p1, %p1338_p6 }
 0x798   : > { %1212 = dma.done.wait (!%p1075_p2), %s902_s12, 128  }
 0x799   : > { %1214 = vsyncadd (!%p1075_p2), %s902_s12, 4294967168  ;;  %p18_p3 = scmp.ge.s32.totalorder %s1321_s11, 4   ;;  %s1565_s27 = smov %s1221_s28 }
 0x79a   : > { %s1566_s28 = smov %s1225_s29  ;;  %s1567_s29 = smov %s1332_s14 }
 0x79b   : > { %s1568_s30 = smov %s1321_s11  ;;  %20 = sbr.rel (!%p18_p3) target bundleno = 3 (0x3), region = 90 }
 0x7a2   :  { %907 = vsyncpa [#allocation4], 1 }
 0x7a3   :  { %909 = vsyncpa [#allocation4 + $0x1], 1 }

</bundles_post_ra>
